<compile_context>
chip_gen: v7x
topology: tpu7x:2x2x1
jax: 0.10.0
libtpu: 0.0.40
codegen_flags: <defaults>
</compile_context>

<pallas_src>
import functools

import jax
import jax.numpy as jnp
from jax.experimental import pallas as pl
from jax.experimental.pallas import tpu as pltpu

_LANE = 128


def _dice_kernel(x_ref, t_ref, o_ref, inter_acc, denom_acc, *,
                 total_p, tile_p, needs_mask):
    """One grid step = one pixel tile (all N samples at once).

    x_ref, t_ref : VMEM (N, tile_p)  predictions / targets for this tile
    o_ref        : VMEM (1, 1)       scalar loss (written on the last step only)
    inter_acc    : VMEM (N, 1)       running sum of x*t per sample
    denom_acc    : VMEM (N, 1)       running sum of x + t per sample
    """
    p = pl.program_id(0)

    @pl.when(p == 0)
    def _():
        inter_acc[...] = jnp.zeros_like(inter_acc)
        denom_acc[...] = jnp.zeros_like(denom_acc)

    x = x_ref[...].astype(jnp.float32)
    t = t_ref[...].astype(jnp.float32)
    n = x.shape[0]

    if needs_mask:
        # The last tile may run past P; OOB block contents are unspecified, and
        # zeros leave all of the sums unchanged.
        lane = jax.lax.broadcasted_iota(jnp.int32, (n, tile_p), 1) + p * tile_p
        valid = lane < total_p
        x = jnp.where(valid, x, 0.0)
        t = jnp.where(valid, t, 0.0)

    inter_acc[...] += jnp.sum(x * t, axis=-1, keepdims=True)
    denom_acc[...] += jnp.sum(x + t, axis=-1, keepdims=True)  # one reduce, not two

    @pl.when(p == pl.num_programs(0) - 1)
    def _():
        smooth = jnp.float32(1.0)
        per_sample = 2.0 * (inter_acc[...] + smooth) / (denom_acc[...] + smooth)  # (N,1)
        loss = jnp.float32(1.0) - jnp.sum(per_sample, keepdims=True) / jnp.float32(n)
        o_ref[...] = loss  # (1,1)


@jax.jit
def dice_loss(x, target):
    """x, target: same shape (N, ...). Returns the scalar DiceLoss."""
    assert x.shape == target.shape, (x.shape, target.shape)
    n = x.shape[0]
    p = 1
    for d in x.shape[1:]:
        p *= d

    # Natural contiguous layout: reshape is metadata-only (no transpose, no pad).
    xf = x.reshape(n, p)
    tf = target.reshape(n, p)

    # Tile the pixel axis: multiple of 128 lanes, per-input block bounded ~2 MiB
    # so VMEM stays small on every TPU generation regardless of image size.
    itemsize = max(xf.dtype.itemsize, tf.dtype.itemsize)
    max_block_bytes = 2 * 1024 * 1024
    tile_p = max(_LANE, (max_block_bytes // (n * itemsize) // _LANE) * _LANE)
    tile_p = min(tile_p, 32768)
    p_ceil = ((p + _LANE - 1) // _LANE) * _LANE
    tile_p = min(tile_p, p_ceil)
    grid_p = pl.cdiv(p, tile_p)
    needs_mask = (p % tile_p) != 0

    kernel = functools.partial(
        _dice_kernel, total_p=p, tile_p=tile_p, needs_mask=needs_mask)

    cost = pl.CostEstimate(
        flops=3 * n * p,
        transcendentals=0,
        bytes_accessed=xf.size * xf.dtype.itemsize
        + tf.size * tf.dtype.itemsize + 4,
    )

    out = pl.pallas_call(
        kernel,
        out_shape=jax.ShapeDtypeStruct((1, 1), jnp.float32),
        grid_spec=pltpu.PrefetchScalarGridSpec(
            num_scalar_prefetch=0,
            grid=(grid_p,),
            in_specs=[
                pl.BlockSpec((n, tile_p), lambda i: (0, i)),   # preds tile
                pl.BlockSpec((n, tile_p), lambda i: (0, i)),   # target tile
            ],
            out_specs=pl.BlockSpec((1, 1), lambda i: (0, 0)),  # scalar loss
            scratch_shapes=[
                pltpu.VMEM((n, 1), jnp.float32),               # intersection sums
                pltpu.VMEM((n, 1), jnp.float32),               # sum(x)+sum(t)
            ],
        ),
        compiler_params=pltpu.CompilerParams(
            dimension_semantics=("arbitrary",),  # accumulators carried across tiles
        ),
        cost_estimate=cost,
    )(xf, tf)

    return out[0, 0]


def _reference(x, target):
    """Pure-JAX mirror of the PyTorch DiceLoss.forward for verification."""
    n = x.shape[0]
    xf = x.reshape(n, -1).astype(jnp.float32)
    tf = target.reshape(n, -1).astype(jnp.float32)
    inter = jnp.sum(xf * tf, axis=1)
    dice = 2.0 * (inter + 1.0) / (jnp.sum(xf, axis=1) + jnp.sum(tf, axis=1) + 1.0)
    return 1.0 - jnp.sum(dice) / n


if __name__ == "__main__":
    key = jax.random.PRNGKey(0)
    k1, k2, k3, k4 = jax.random.split(key, 4)

    # Case 1: typical segmentation-style inputs, (N, C, H, W) = (2, 4, 16, 16).
    N, C, H, W = 2, 4, 16, 16
    logits = jax.random.normal(k1, (N, C, H, W), jnp.float32)
    preds = jax.nn.softmax(logits, axis=1)
    labels = jax.random.randint(k2, (N, H, W), 0, C)
    target = jax.nn.one_hot(labels, C, axis=1, dtype=jnp.float32)  # (N, C, H, W)

    loss = dice_loss(preds, target)
    jax.block_until_ready(loss)
    ref = _reference(preds, target)
    assert jnp.allclose(loss, ref, rtol=1e-5, atol=1e-5), (loss, ref)

    # Case 2: non-multiple-of-128 flattened size exercises the in-kernel masking.
    x2 = jax.nn.sigmoid(jax.random.normal(k3, (2, 3, 10, 10), jnp.float32))
    t2 = (jax.random.uniform(k4, (2, 3, 10, 10)) > 0.5).astype(jnp.float32)
    loss2 = dice_loss(x2, t2)
    jax.block_until_ready(loss2)
    ref2 = _reference(x2, t2)
    assert jnp.allclose(loss2, ref2, rtol=1e-5, atol=1e-5), (loss2, ref2)

    print("KERNEL_OK")
</pallas_src>

<mosaic_0001>
module attributes {stable_mosaic.version = 11 : i64} {
  func.func @_dice_kernel(%arg0: i32, %arg1: memref<2x1024xf32, #tpu.memory_space<vmem>>, %arg2: memref<2x1024xf32, #tpu.memory_space<vmem>>, %arg3: memref<1x1xf32, #tpu.memory_space<vmem>>, %arg4: memref<2x1xf32, #tpu.memory_space<vmem>>, %arg5: memref<2x1xf32, #tpu.memory_space<vmem>>) attributes {dimension_semantics = [#tpu.dimension_semantics<arbitrary>], iteration_bounds = array<i64: 1>, scalar_prefetch = 0 : i64, scratch_operands = 2 : i64, tpu.core_type = #tpu.core_type<tc>, window_params = [{transform_indices = @transform_0, window_bounds = array<i64: 2, 1024>}, {transform_indices = @transform_1, window_bounds = array<i64: 2, 1024>}, {pipeline_mode = #tpu.pipeline_mode<synchronous>, transform_indices = @transform_2, window_bounds = array<i64: 1, 1>}]} {
    %c0_i32 = arith.constant 0 : i32
    %0 = arith.cmpi eq, %arg0, %c0_i32 : i32
    %1 = arith.extui %0 : i1 to i32
    %c0_i32_0 = arith.constant 0 : i32
    %2 = arith.cmpi ne, %1, %c0_i32_0 : i32
    scf.if %2 {
      %cst_15 = arith.constant 0.000000e+00 : f32
      %20 = vector.broadcast %cst_15 : f32 to vector<2x1xf32>
      %c0_16 = arith.constant 0 : index
      %c0_17 = arith.constant 0 : index
      %21 = vector.load %arg4[%c0_16, %c0_17] : memref<2x1xf32, #tpu.memory_space<vmem>>, vector<2x1xf32>
      tpu.vector_store %arg4[%c0_16, %c0_17], %20 {strides = array<i32>} : memref<2x1xf32, #tpu.memory_space<vmem>>, vector<2x1xf32>,
      %cst_18 = arith.constant 0.000000e+00 : f32
      %22 = vector.broadcast %cst_18 : f32 to vector<2x1xf32>
      %c0_19 = arith.constant 0 : index
      %c0_20 = arith.constant 0 : index
      %23 = vector.load %arg5[%c0_19, %c0_20] : memref<2x1xf32, #tpu.memory_space<vmem>>, vector<2x1xf32>
      tpu.vector_store %arg5[%c0_19, %c0_20], %22 {strides = array<i32>} : memref<2x1xf32, #tpu.memory_space<vmem>>, vector<2x1xf32>,
    } else {
    }
    %c0 = arith.constant 0 : index
    %c0_1 = arith.constant 0 : index
    %3 = vector.load %arg1[%c0, %c0_1] : memref<2x1024xf32, #tpu.memory_space<vmem>>, vector<2x1024xf32>
    %c0_2 = arith.constant 0 : index
    %c0_3 = arith.constant 0 : index
    %4 = vector.load %arg2[%c0_2, %c0_3] : memref<2x1024xf32, #tpu.memory_space<vmem>>, vector<2x1024xf32>
    %c0_4 = arith.constant 0 : index
    %c0_5 = arith.constant 0 : index
    %5 = vector.load %arg4[%c0_4, %c0_5] : memref<2x1xf32, #tpu.memory_space<vmem>>, vector<2x1xf32>
    %6 = arith.mulf %3, %4 : vector<2x1024xf32>
    %cst = arith.constant dense<0.000000e+00> : vector<2xf32>
    %7 = vector.multi_reduction <add>, %6, %cst [1] : vector<2x1024xf32> to vector<2xf32>
    %8 = vector.shape_cast %7 : vector<2xf32> to vector<2x1xf32>
    %9 = arith.addf %5, %8 : vector<2x1xf32>
    %c0_6 = arith.constant 0 : index
    %c0_7 = arith.constant 0 : index
    %10 = vector.load %arg4[%c0_6, %c0_7] : memref<2x1xf32, #tpu.memory_space<vmem>>, vector<2x1xf32>
    tpu.vector_store %arg4[%c0_6, %c0_7], %9 {strides = array<i32>} : memref<2x1xf32, #tpu.memory_space<vmem>>, vector<2x1xf32>,
    %c0_8 = arith.constant 0 : index
    %c0_9 = arith.constant 0 : index
    %11 = vector.load %arg5[%c0_8, %c0_9] : memref<2x1xf32, #tpu.memory_space<vmem>>, vector<2x1xf32>
    %12 = arith.addf %3, %4 : vector<2x1024xf32>
    %cst_10 = arith.constant dense<0.000000e+00> : vector<2xf32>
    %13 = vector.multi_reduction <add>, %12, %cst_10 [1] : vector<2x1024xf32> to vector<2xf32>
    %14 = vector.shape_cast %13 : vector<2xf32> to vector<2x1xf32>
    %15 = arith.addf %11, %14 : vector<2x1xf32>
    %c0_11 = arith.constant 0 : index
    %c0_12 = arith.constant 0 : index
    %16 = vector.load %arg5[%c0_11, %c0_12] : memref<2x1xf32, #tpu.memory_space<vmem>>, vector<2x1xf32>
    tpu.vector_store %arg5[%c0_11, %c0_12], %15 {strides = array<i32>} : memref<2x1xf32, #tpu.memory_space<vmem>>, vector<2x1xf32>,
    %c0_i32_13 = arith.constant 0 : i32
    %17 = arith.cmpi eq, %arg0, %c0_i32_13 : i32
    %18 = arith.extui %17 : i1 to i32
    %c0_i32_14 = arith.constant 0 : i32
    %19 = arith.cmpi ne, %18, %c0_i32_14 : i32
    scf.if %19 {
      %c0_15 = arith.constant 0 : index
      %c0_16 = arith.constant 0 : index
      %20 = vector.load %arg4[%c0_15, %c0_16] : memref<2x1xf32, #tpu.memory_space<vmem>>, vector<2x1xf32>
      %cst_17 = arith.constant 1.000000e+00 : f32
      %21 = vector.broadcast %cst_17 : f32 to vector<2x1xf32>
      %22 = arith.addf %20, %21 : vector<2x1xf32>
      %cst_18 = arith.constant 2.000000e+00 : f32
      %23 = vector.broadcast %cst_18 : f32 to vector<2x1xf32>
      %24 = arith.mulf %23, %22 : vector<2x1xf32>
      %c0_19 = arith.constant 0 : index
      %c0_20 = arith.constant 0 : index
      %25 = vector.load %arg5[%c0_19, %c0_20] : memref<2x1xf32, #tpu.memory_space<vmem>>, vector<2x1xf32>
      %cst_21 = arith.constant 1.000000e+00 : f32
      %26 = vector.broadcast %cst_21 : f32 to vector<2x1xf32>
      %27 = arith.addf %25, %26 : vector<2x1xf32>
      %28 = arith.divf %24, %27 : vector<2x1xf32>
      %29 = vector.shape_cast %28 : vector<2x1xf32> to vector<1x2x1xf32>
      %cst_22 = arith.constant dense<0.000000e+00> : vector<1xf32>
      %30 = vector.multi_reduction <add>, %29, %cst_22 [1, 2] : vector<1x2x1xf32> to vector<1xf32>
      %31 = vector.shape_cast %30 : vector<1xf32> to vector<1x1x1xf32>
      %32 = vector.extract %31[0, 0, 0] : f32 from vector<1x1x1xf32>
      %33 = vector.broadcast %32 : f32 to vector<1x1xf32>
      %cst_23 = arith.constant 2.000000e+00 : f32
      %34 = vector.broadcast %cst_23 : f32 to vector<1x1xf32>
      %35 = arith.divf %33, %34 : vector<1x1xf32>
      %cst_24 = arith.constant 1.000000e+00 : f32
      %36 = vector.broadcast %cst_24 : f32 to vector<1x1xf32>
      %37 = arith.subf %36, %35 : vector<1x1xf32>
      %c0_25 = arith.constant 0 : index
      %c0_26 = arith.constant 0 : index
      %38 = vector.load %arg3[%c0_25, %c0_26] : memref<1x1xf32, #tpu.memory_space<vmem>>, vector<1x1xf32>
      tpu.vector_store %arg3[%c0_25, %c0_26], %37 {strides = array<i32>} : memref<1x1xf32, #tpu.memory_space<vmem>>, vector<1x1xf32>,
    } else {
    }
    return
  }
  func.func @transform_0(%arg0: i32) -> (i32, i32) {
    %c0_i32 = arith.constant 0 : i32
    %c0_i32_0 = arith.constant 0 : i32
    return %c0_i32, %arg0 : i32, i32
  }
  func.func @transform_1(%arg0: i32) -> (i32, i32) {
    %c0_i32 = arith.constant 0 : i32
    %c0_i32_0 = arith.constant 0 : i32
    return %c0_i32, %arg0 : i32, i32
  }
  func.func @transform_2(%arg0: i32) -> (i32, i32) {
    %c0_i32 = arith.constant 0 : i32
    %c0_i32_0 = arith.constant 0 : i32
    %c0_i32_1 = arith.constant 0 : i32
    return %c0_i32, %c0_i32_0 : i32, i32
  }
}

</mosaic_0001>

<bundles_post_ra>
// kernel: dice_loss.1
= control target key start
LH: loop header
LB: loop body
LE: loop exit
PB: predicated region body
PF: predicated region fallthrough
CT: control target
= control target key end

     0   :  { %v32_v2 = vlaneseq  ;;  %v228_v3 = vmov 1983009808   ;;  %s291_s0 = inlined_call_operand.vmem [shape: f32[2,1024], index: 0, kind: input, shape index: {}]   ;;  %s292_s1 = inlined_call_operand.vmem [shape: f32[2,1024], index: 1, kind: input, shape index: {}]   ;;  %s293_s2 = inlined_call_operand.hbm [shape: f32[1,1], index: 2, kind: output, shape index: {}]  }
   0x1   :  { %v19_v0 = vld [vmem:[%s291_s0] sm:$0xff]  ;;  %v30_v4 = vunpack.c.l.s4 %v228_v3 }
   0x2   :  { %v21_v1 = vld [vmem:[%s292_s1] sm:$0xff] }
   0x3   :  { %v92_v5 = vadd.f32 %v21_v1, %v19_v0 }
   0x4   :  { %7 = vsyncpa [#allocation5], 0  ;;  %v20_v6 = vld [vmem:[%s291_s0 + $0x8] sm:$0xff]  ;;  %v33_v8 = vshrl.u32 %v32_v2, 7  ;;  %v24_v9 = vmul.f32 %v21_v1, %v19_v0  ;;  %v31_v10 = vunpack.c.0.s8 %v30_v4  ;;  %vm70_vm0 = vcmask 1041408  }
   0x5   :  { %v22_v7 = vld [vmem:[%s292_s1 + $0x8] sm:$0xff]  ;;  %v96_v11 = vcombine.high %v92_v5, %v92_v5  ;;  %vm16_vm1 = vcmask 1024   ;;  %v229_v0 = vmov 0.0   ;;  %s230_s1 = smov [#allocation4]   ;;  %vm181_vm2 = vcmask 0  }
   0x6   :  { %v28_v12 = vcombine.high %v24_v9, %v24_v9  ;;  %v34_v13 = vsub.s32 %v31_v10, %v33_v8  ;;  %v93_v14 = vadd.f32 %v22_v7, %v20_v6  ;;  %v25_v17 = vmul.f32 %v22_v7, %v20_v6  ;;  %18 = vst.msk [vmem:[#allocation3] sm:$0x3] %vm16_vm1, %v229_v0  ;;  %s189_s17 = sshll.u32 %s230_s1, 4  ;;  %s190_s17 = int_to_ptr.vmem [resolvable:$true] %s189_s17 }
   0x7   :  { %17 = vst.msk [vmem:[#allocation2] sm:$0x3] %vm16_vm1, %v229_v0  ;;  %s204_s18 = scalar_lea.vmem %s190_s17, 16  ;;  %s208_s19 = scalar_lea.vmem %s190_s17, 32 }
   0x8   :  { %v103_v15 = vrot.slane %v92_v5, %v34_v13  ;;  %v110_v16 = vrot.slane %v96_v11, %v34_v13  ;;  %v35_v18 = vrot.slane %v24_v9, %v34_v13  ;;  %v42_v19 = vrot.slane %v28_v12, %v34_v13  ;;  %p205_p0 = scmp.ne.s32.totalorder %s190_s17, %s204_s18  ;;  %p209_p1 = scmp.lt.s32.totalorder %s190_s17, %s190_s17 }
   0x9   :  { %v113_v22 = vcombine.high %v93_v14, %v93_v14  ;;  %v120_v23 = vrot.slane %v93_v14, %v34_v13  ;;  %v45_v27 = vcombine.high %v25_v17, %v25_v17  ;;  %v52_v31 = vrot.slane %v25_v17, %v34_v13  ;;  %p210_p2 = scmp.lt.s32.totalorder %s208_s19, %s204_s18 }
   0xa   :  { %v111_v20 = vcombine.high %v103_v15, %v103_v15  ;;  %v112_v21 = vcombine.high %v110_v16, %v110_v16  ;;  %v138_v24 = vsel %vm70_vm0, %v103_v15, 0.0  ;;  %v141_v26 = vsel %vm70_vm0, %v110_v16, 0.0 }
   0xb   :  { %v43_v29 = vcombine.high %v35_v18, %v35_v18  ;;  %v44_v30 = vcombine.high %v42_v19, %v42_v19  ;;  %v127_v32 = vrot.slane %v113_v22, %v34_v13  ;;  %v128_v33 = vcombine.high %v120_v23, %v120_v23  ;;  %p211_p3 = por %p210_p2, %p209_p1 }
   0xc   :  { %v139_v25 = vsel %vm70_vm0, %v111_v20, 0.0  ;;  %v143_v34 = vsel %vm70_vm0, %v112_v21, 0.0  ;;  %v71_v35 = vsel %vm70_vm0, %v35_v18, 0.0  ;;  %v74_v38 = vsel %vm70_vm0, %v42_v19, 0.0 }
   0xd   :  { %v140_v28 = vadd.f32 %v139_v25, %v138_v24  ;;  %v72_v37 = vsel %vm70_vm0, %v43_v29, 0.0  ;;  %v145_v39 = vsel %vm70_vm0, %v120_v23, 0.0  ;;  %v59_v42 = vrot.slane %v45_v27, %v34_v13  ;;  %v91_v1 = vld [vmem:[#allocation3] sm:$0x3]  ;;  %p212_p4 = pnand %p211_p3, %p205_p0 }
   0xe   :  { %v73_v40 = vadd.f32 %v72_v37, %v71_v35  ;;  %v60_v43 = vcombine.high %v52_v31, %v52_v31  ;;  %v76_v44 = vsel %vm70_vm0, %v44_v30, 0.0  ;;  %v129_v45 = vcombine.high %v127_v32, %v127_v32  ;;  %v23_v4 = vld [vmem:[#allocation2] sm:$0x3] }
   0xf   :  { %v142_v36 = vadd.f32 %v141_v26, %v140_v28  ;;  %v147_v46 = vsel %vm70_vm0, %v128_v33, 0.0  ;;  %v78_v49 = vsel %vm70_vm0, %v52_v31, 0.0  ;;  %v149_v50 = vsel %vm70_vm0, %v127_v32, 0.0 }
  0x10   :  { %v75_v47 = vadd.f32 %v74_v38, %v73_v40  ;;  %v61_v53 = vcombine.high %v59_v42, %v59_v42  ;;  %v80_v54 = vsel %vm70_vm0, %v60_v43, 0.0  ;;  %v151_v55 = vsel %vm70_vm0, %v129_v45, 0.0 }
  0x11   :  { %v144_v41 = vadd.f32 %v143_v34, %v142_v36  ;;  %v82_v58 = vsel %vm70_vm0, %v59_v42, 0.0 }
  0x12   :  { %v77_v51 = vadd.f32 %v76_v44, %v75_v47  ;;  %v84_v61 = vsel %vm70_vm0, %v61_v53, 0.0 }
  0x13   :  { %v146_v48 = vadd.f32 %v145_v39, %v144_v41 }
  0x14   :  { %v79_v56 = vadd.f32 %v78_v49, %v77_v51 }
  0x15   :  { %v148_v52 = vadd.f32 %v147_v46, %v146_v48 }
  0x16   :  { %v81_v59 = vadd.f32 %v80_v54, %v79_v56 }
  0x17   :  { %v150_v57 = vadd.f32 %v149_v50, %v148_v52 }
  0x18   :  { %v83_v62 = vadd.f32 %v82_v58, %v81_v59 }
  0x19   :  { %v152_v60 = vadd.f32 %v151_v55, %v150_v57 }
  0x1a   :  { %v85_v63 = vadd.f32 %v84_v61, %v83_v62 }
  0x1b   :  { %153 = vadd.xlane.f32.xlu0 %v152_v60 }
  0x1f   :  { %86 = vadd.xlane.f32.xlu0 %v85_v63 }
  0xa8   :  { %v154_v2 = vpop.xlane.xlu0 %153 }
  0xa9   :  { %v155_v3 = vadd.f32 %v154_v2, %v91_v1 }
  0xab   :  { %156 = vst.msk [vmem:[#allocation3] sm:$0x3] %vm16_vm1, %v155_v3 }
  0xac   :  { %v87_v5 = vpop.xlane.xlu0 %86 }
  0xad   :  { %v88_v6 = vadd.f32 %v87_v5, %v23_v4 }
  0xaf   :  { %90 = vst.msk [vmem:[#allocation2] sm:$0x3] %vm16_vm1, %v88_v6 }
  0xb2   :  { %v163_v7 = vld [vmem:[#allocation3] sm:$0x3] }
  0xb3   :  { %v164_v8 = vadd.f32 1.0, %v163_v7 }
  0xb5   :  { %202 = vrcp.f32 %v164_v8 }
  0xb6   :  { %v160_v9 = vld [vmem:[#allocation2] sm:$0x3] }
  0xb7   :  { %v161_v10 = vadd.f32 1.0, %v160_v9 }
  0xb9   :  { %v162_v11 = vmul.f32 2.0, %v161_v10 }
  0xbf   :  { %v203_v12 = vpop.eup %202 }
  0xc0   :  { %v166_v13 = vmul.f32 %v203_v12, %v162_v11 }
  0xc2   :  { %v167_v14 = vsel %vm16_vm1, %v166_v13, 0.0 }
  0xc3   :  { %168 = vadd.xlane.f32.xlu1 %v167_v14 }
 0x150   :  { %v169_v15 = vpop.xlane.xlu1 %168 }
 0x151   :  { %v170_v16 = vrot.slane %v169_v15, 4 }
 0x153   :  { %v171_v17 = vadd.f32 %v170_v16, %v169_v15 }
 0x155   :  { %v172_v18 = vrot.slane %v171_v17, 2 }
 0x157   :  { %v173_v19 = vadd.f32 %v172_v18, %v171_v17 }
 0x159   :  { %v174_v20 = vrot.slane %v173_v19, 1 }
 0x15b   :  { %v175_v21 = vadd.f32 %v174_v20, %v173_v19 }
 0x15d   :  { %197 = vpush %v175_v21 }
 0x18e   :  { %s198_s0 = spop %197 }
 0x18f   :  { %v177_v22 = vstv %s198_s0 }
 0x190   :  { %v179_v23 = vmul.f32 0.5, %v177_v22 }
 0x192   :  { %v180_v24 = vsub.f32 1.0, %v179_v23 }
 0x194   :  { %182 = vst.msk [vmem:[#allocation4] sm:$0x1] %vm181_vm2, %v180_v24 }
 0x195   :  { %215 = shalt.err (!%p212_p4)
}
 0x196   :  { %s216_s22 = scalar_lea.hbm %s293_s2, 16 }
 0x197   :  { %p217_p5 = scmp.ne.s32.totalorder %s293_s2, %s216_s22  ;;  %p220_p6 = scmp.lt.u32.totalorder %s216_s22, %s293_s2 }
 0x199   :  { %p222_p7 = pnand %p220_p6, %p217_p5 }
 0x19b   :  { %225 = shalt.err (!%p222_p7)
}
 0x19c   :  { %192 = dma.vmem_to_hbm [thread:$0]  %s190_s17, 16, %s293_s2, [#allocation5]  }
 0x19d   :  { %226 = dma.done.wait [#allocation5], 16  }
 0x19e   :  { %227 = vsyncadd [#allocation5], 4294967280 }
 0x19f   :  { %196 = vsyncpa [#allocation5], 1 }

</bundles_post_ra>
